<compile_context>
chip_gen: v7x
topology: tpu7x:2x2x1
jax: 0.10.0
libtpu: 0.0.40
codegen_flags: <defaults>
</compile_context>

<pallas_src>
import functools
import math

import jax
import jax.numpy as jnp
from jax.experimental import pallas as pl
from jax.experimental.pallas import tpu as pltpu

_INV_SQRT2 = 1.0 / math.sqrt(2.0)


def _gelu_exact(x):
    # PyTorch nn.GELU default: 0.5 * x * (1 + erf(x / sqrt(2)))
    return 0.5 * x * (1.0 + jax.lax.erf(x * _INV_SQRT2))


def _color_attn_kernel(x_ref, w1t_ref, w2t_ref, o_ref, sum_acc, max_acc,
                       *, hw_total, hw_tile, tb, mask_hw):
    # x_ref : (tb, C, hw_tile)   w1t_ref: (C, hidden)   w2t_ref: (hidden, C)
    # o_ref : (tb, C)            sum_acc/max_acc: (tb, C) f32 VMEM scratch
    k = pl.program_id(1)

    @pl.when(k == 0)
    def _init():
        sum_acc[...] = jnp.zeros_like(sum_acc)
        max_acc[...] = jnp.full_like(max_acc, -jnp.inf)

    tile = x_ref[...]                                   # native dtype, no full f32 copy
    if mask_hw:
        lane = jax.lax.broadcasted_iota(jnp.int32, tile.shape, dimension=2)
        valid = (k * hw_tile + lane) < hw_total
        sum_tile = jnp.where(valid, tile, jnp.zeros((), tile.dtype))
        max_tile = jnp.where(valid, tile,
                             jnp.asarray(jnp.finfo(tile.dtype).min, tile.dtype))
    else:
        sum_tile = tile
        max_tile = tile

    # Pooling hot path: sum accumulated in f32, max in native dtype (exact).
    sum_acc[...] += jnp.sum(sum_tile, axis=-1, dtype=jnp.float32)
    max_acc[...] = jnp.maximum(max_acc[...],
                               jnp.max(max_tile, axis=-1).astype(jnp.float32))

    @pl.when(k == pl.num_programs(1) - 1)
    def _epilogue():
        avg = sum_acc[...] * (1.0 / hw_total)           # (tb, C)
        mx = max_acc[...]                               # (tb, C)
        pooled = jnp.concatenate([avg, mx], axis=0)     # (2*tb, C) -> fused branches
        w1t = w1t_ref[...].astype(jnp.float32)          # (C, hidden)  (transpose hoisted)
        w2t = w2t_ref[...].astype(jnp.float32)          # (hidden, C)
        h = _gelu_exact(jnp.dot(pooled, w1t, preferred_element_type=jnp.float32))
        y = jnp.dot(h, w2t, preferred_element_type=jnp.float32)  # (2*tb, C)
        out = jax.nn.sigmoid(y[:tb] + y[tb:])
        o_ref[...] = out.astype(o_ref.dtype)


def color_attention_adapter(x, w1, w2, change_channel=False,
                            max_hw_tile=16384,
                            vmem_budget_bytes=8 * 1024 * 1024):
    """x: NCHW (or NHWC if change_channel=True, matching the PyTorch permute)."""
    if change_channel:
        # Glue, like x.permute(0, 3, 1, 2).contiguous() in torch.
        x = jnp.transpose(x, (0, 3, 1, 2))

    B, C, H, W = x.shape
    hidden = w1.shape[0]
    assert w1.shape == (hidden, C) and w2.shape == (C, hidden)

    HW = H * W
    x_flat = x.reshape(B, C, HW)
    itemsize = jnp.dtype(x.dtype).itemsize

    # ---- tile selection (double-buffered x block must fit the VMEM budget) ----
    tb = B if B <= 8 else 8                          # row tile: full B or 8
    per_elem = 2 * tb * C * itemsize                 # bytes per HW element (2 buffers)
    th_cap = max(128, (vmem_budget_bytes // per_elem // 128) * 128)
    if HW <= min(th_cap, max_hw_tile):
        th = HW                                      # full spatial extent in one block
    else:
        th = min(th_cap, max(128, (max_hw_tile // 128) * 128))
    mask_hw = (HW % th) != 0                         # partial last HW tile -> mask in kernel

    # Hoist the weight transposes out of the kernel (one-time layout plumbing).
    w1t = jnp.transpose(w1)                          # (C, hidden)
    w2t = jnp.transpose(w2)                          # (hidden, C)

    kernel = functools.partial(_color_attn_kernel, hw_total=HW, hw_tile=th,
                               tb=tb, mask_hw=mask_hw)

    cost = pl.CostEstimate(
        flops=int(2 * B * C * HW + 2 * (2 * B) * C * hidden * 2),
        transcendentals=int(2 * B * hidden + B * C),
        bytes_accessed=int(B * C * HW * itemsize
                           + (w1.size + w2.size) * jnp.dtype(w1.dtype).itemsize
                           + B * C * itemsize),
    )

    out = pl.pallas_call(
        kernel,
        out_shape=jax.ShapeDtypeStruct((B, C), x.dtype),
        grid_spec=pltpu.PrefetchScalarGridSpec(
            num_scalar_prefetch=0,
            grid=(pl.cdiv(B, tb), pl.cdiv(HW, th)),
            in_specs=[
                pl.BlockSpec((tb, C, th), lambda b, k: (b, 0, k)),
                pl.BlockSpec((C, hidden), lambda b, k: (0, 0)),
                pl.BlockSpec((hidden, C), lambda b, k: (0, 0)),
            ],
            # Output block index constant over the HW axis -> stays resident, one writeback.
            out_specs=pl.BlockSpec((tb, C), lambda b, k: (b, 0)),
            scratch_shapes=[
                pltpu.VMEM((tb, C), jnp.float32),    # running sum
                pltpu.VMEM((tb, C), jnp.float32),    # running max
            ],
        ),
        compiler_params=pltpu.CompilerParams(
            # row axis parallel (megacore splits the pooling), reduction axis last.
            dimension_semantics=("parallel", "arbitrary"),
        ),
        cost_estimate=cost,
    )(x_flat, w1t, w2t)

    if change_channel:
        return out.reshape(B, 1, 1, C)               # matches .view(B, 1, 1, -1)
    return out.reshape(B, C, 1, 1)                   # matches .view(B, C, 1, 1)


def _reference(x, w1, w2):
    # Pure-JAX reference of the PyTorch forward (change=False), NCHW input.
    avg = jnp.mean(x, axis=(2, 3))
    mx = jnp.max(x, axis=(2, 3))

    def branch(p):
        h = p @ w1.T
        h = 0.5 * h * (1.0 + jax.lax.erf(h / math.sqrt(2.0)))
        return h @ w2.T

    return jax.nn.sigmoid(branch(avg) + branch(mx)).reshape(x.shape[0], x.shape[1], 1, 1)


if __name__ == "__main__":
    key = jax.random.PRNGKey(0)
    kx, k1, k2, kodd = jax.random.split(key, 4)

    # embedding_dim=32, mlp_ratio=0.25 -> hidden=8 ; spatial 16x16, batch 2
    B, C, H, W = 2, 32, 16, 16
    hidden = int(C * 0.25)

    x = jax.random.normal(kx, (B, C, H, W), dtype=jnp.float32)
    w1 = jax.random.normal(k1, (hidden, C), dtype=jnp.float32) * (1.0 / math.sqrt(C))
    w2 = jax.random.normal(k2, (C, hidden), dtype=jnp.float32) * (1.0 / math.sqrt(hidden))

    ref = _reference(x, w1, w2)

    # 1) default tiling (HW fits in one block)
    out = jax.block_until_ready(color_attention_adapter(x, w1, w2))
    assert out.shape == (B, C, 1, 1), out.shape
    assert jnp.allclose(out, ref, atol=1e-5, rtol=1e-5), float(jnp.max(jnp.abs(out - ref)))

    # 2) change_channel=True path (NHWC input, output view (B, 1, 1, C))
    x_nhwc = jnp.transpose(x, (0, 2, 3, 1))
    out2 = jax.block_until_ready(
        color_attention_adapter(x_nhwc, w1, w2, change_channel=True))
    assert out2.shape == (B, 1, 1, C), out2.shape
    assert jnp.allclose(out2.reshape(B, C), ref.reshape(B, C), atol=1e-5, rtol=1e-5)

    # 3) odd spatial size (17x17) with a small HW tile -> exercises multi-step
    #    accumulation (init/epilogue pipeline) AND the masked partial last tile.
    x_odd = jax.random.normal(kodd, (B, C, 17, 17), dtype=jnp.float32)
    ref_odd = _reference(x_odd, w1, w2)
    out3 = jax.block_until_ready(color_attention_adapter(x_odd, w1, w2, max_hw_tile=128))
    assert jnp.allclose(out3, ref_odd, atol=1e-5, rtol=1e-5), \
        float(jnp.max(jnp.abs(out3 - ref_odd)))

    print("KERNEL_OK")
</pallas_src>

<mosaic_0001>
module attributes {stable_mosaic.version = 11 : i64} {
  func.func @_color_attn_kernel(%arg0: i32, %arg1: i32, %arg2: memref<2x32x256xf32, #tpu.memory_space<vmem>>, %arg3: memref<32x8xf32, #tpu.memory_space<vmem>>, %arg4: memref<8x32xf32, #tpu.memory_space<vmem>>, %arg5: memref<2x32xf32, #tpu.memory_space<vmem>>, %arg6: memref<2x32xf32, #tpu.memory_space<vmem>>, %arg7: memref<2x32xf32, #tpu.memory_space<vmem>>) attributes {dimension_semantics = [#tpu.dimension_semantics<parallel>, #tpu.dimension_semantics<arbitrary>], iteration_bounds = array<i64: 1, 1>, scalar_prefetch = 0 : i64, scratch_operands = 2 : i64, tpu.core_type = #tpu.core_type<tc>, window_params = [{transform_indices = @transform_0, window_bounds = array<i64: 2, 32, 256>}, {pipeline_mode = #tpu.pipeline_mode<synchronous>, transform_indices = @transform_1, window_bounds = array<i64: 32, 8>}, {pipeline_mode = #tpu.pipeline_mode<synchronous>, transform_indices = @transform_2, window_bounds = array<i64: 8, 32>}, {transform_indices = @transform_3, window_bounds = array<i64: 2, 32>}]} {
    %c0_i32 = arith.constant 0 : i32
    %0 = arith.cmpi eq, %arg1, %c0_i32 : i32
    %1 = arith.extui %0 : i1 to i32
    %c0_i32_0 = arith.constant 0 : i32
    %2 = arith.cmpi ne, %1, %c0_i32_0 : i32
    scf.if %2 {
      %cst_14 = arith.constant 0.000000e+00 : f32
      %15 = vector.broadcast %cst_14 : f32 to vector<2x32xf32>
      %c0_15 = arith.constant 0 : index
      %c0_16 = arith.constant 0 : index
      %16 = vector.load %arg6[%c0_15, %c0_16] : memref<2x32xf32, #tpu.memory_space<vmem>>, vector<2x32xf32>
      tpu.vector_store %arg6[%c0_15, %c0_16], %15 {strides = array<i32>} : memref<2x32xf32, #tpu.memory_space<vmem>>, vector<2x32xf32>,
      %cst_17 = arith.constant 0xFF800000 : f32
      %17 = vector.broadcast %cst_17 : f32 to vector<2x32xf32>
      %c0_18 = arith.constant 0 : index
      %c0_19 = arith.constant 0 : index
      %18 = vector.load %arg7[%c0_18, %c0_19] : memref<2x32xf32, #tpu.memory_space<vmem>>, vector<2x32xf32>
      tpu.vector_store %arg7[%c0_18, %c0_19], %17 {strides = array<i32>} : memref<2x32xf32, #tpu.memory_space<vmem>>, vector<2x32xf32>,
    } else {
    }
    %c0 = arith.constant 0 : index
    %c0_1 = arith.constant 0 : index
    %c0_2 = arith.constant 0 : index
    %3 = vector.load %arg2[%c0, %c0_1, %c0_2] : memref<2x32x256xf32, #tpu.memory_space<vmem>>, vector<2x32x256xf32>
    %c0_3 = arith.constant 0 : index
    %c0_4 = arith.constant 0 : index
    %4 = vector.load %arg6[%c0_3, %c0_4] : memref<2x32xf32, #tpu.memory_space<vmem>>, vector<2x32xf32>
    %cst = arith.constant dense<0.000000e+00> : vector<2x32xf32>
    %5 = vector.multi_reduction <add>, %3, %cst [2] : vector<2x32x256xf32> to vector<2x32xf32>
    %6 = arith.addf %4, %5 : vector<2x32xf32>
    %c0_5 = arith.constant 0 : index
    %c0_6 = arith.constant 0 : index
    %7 = vector.load %arg6[%c0_5, %c0_6] : memref<2x32xf32, #tpu.memory_space<vmem>>, vector<2x32xf32>
    tpu.vector_store %arg6[%c0_5, %c0_6], %6 {strides = array<i32>} : memref<2x32xf32, #tpu.memory_space<vmem>>, vector<2x32xf32>,
    %c0_7 = arith.constant 0 : index
    %c0_8 = arith.constant 0 : index
    %8 = vector.load %arg7[%c0_7, %c0_8] : memref<2x32xf32, #tpu.memory_space<vmem>>, vector<2x32xf32>
    %cst_9 = arith.constant dense<0xFF800000> : vector<2x32xf32>
    %9 = vector.multi_reduction <maximumf>, %3, %cst_9 [2] : vector<2x32x256xf32> to vector<2x32xf32>
    %10 = arith.maximumf %8, %9 : vector<2x32xf32>
    %c0_10 = arith.constant 0 : index
    %c0_11 = arith.constant 0 : index
    %11 = vector.load %arg7[%c0_10, %c0_11] : memref<2x32xf32, #tpu.memory_space<vmem>>, vector<2x32xf32>
    tpu.vector_store %arg7[%c0_10, %c0_11], %10 {strides = array<i32>} : memref<2x32xf32, #tpu.memory_space<vmem>>, vector<2x32xf32>,
    %c0_i32_12 = arith.constant 0 : i32
    %12 = arith.cmpi eq, %arg1, %c0_i32_12 : i32
    %13 = arith.extui %12 : i1 to i32
    %c0_i32_13 = arith.constant 0 : i32
    %14 = arith.cmpi ne, %13, %c0_i32_13 : i32
    scf.if %14 {
      %c0_14 = arith.constant 0 : index
      %c0_15 = arith.constant 0 : index
      %15 = vector.load %arg6[%c0_14, %c0_15] : memref<2x32xf32, #tpu.memory_space<vmem>>, vector<2x32xf32>
      %cst_16 = arith.constant 3.906250e-03 : f32
      %16 = vector.broadcast %cst_16 : f32 to vector<2x32xf32>
      %17 = arith.mulf %15, %16 : vector<2x32xf32>
      %c0_17 = arith.constant 0 : index
      %c0_18 = arith.constant 0 : index
      %18 = vector.load %arg7[%c0_17, %c0_18] : memref<2x32xf32, #tpu.memory_space<vmem>>, vector<2x32xf32>
      %19 = tpu.concatenate %17, %18 in 0 : vector<2x32xf32>, vector<2x32xf32> -> vector<4x32xf32>
      %c0_19 = arith.constant 0 : index
      %c0_20 = arith.constant 0 : index
      %20 = vector.load %arg3[%c0_19, %c0_20] : memref<32x8xf32, #tpu.memory_space<vmem>>, vector<32x8xf32>
      %c0_21 = arith.constant 0 : index
      %c0_22 = arith.constant 0 : index
      %21 = vector.load %arg4[%c0_21, %c0_22] : memref<8x32xf32, #tpu.memory_space<vmem>>, vector<8x32xf32>
      %cst_23 = arith.constant dense<0.000000e+00> : vector<4x8xf32>
      %22 = tpu.matmul %19, %20, %cst_23 {dimension_numbers = #tpu.dot_dimension_numbers<[1], [0], [0], [1], [0, 0, 1, 1], [], []>} : vector<4x32xf32>, vector<32x8xf32>, vector<4x8xf32> -> vector<4x8xf32>
      %cst_24 = arith.constant 5.000000e-01 : f32
      %23 = vector.broadcast %cst_24 : f32 to vector<4x8xf32>
      %24 = arith.mulf %23, %22 : vector<4x8xf32>
      %cst_25 = arith.constant 0.707106769 : f32
      %25 = vector.broadcast %cst_25 : f32 to vector<4x8xf32>
      %26 = arith.mulf %22, %25 : vector<4x8xf32>
      %27 = math.erf %26 : vector<4x8xf32>
      %cst_26 = arith.constant 1.000000e+00 : f32
      %28 = vector.broadcast %cst_26 : f32 to vector<4x8xf32>
      %29 = arith.addf %28, %27 : vector<4x8xf32>
      %30 = arith.mulf %24, %29 : vector<4x8xf32>
      %cst_27 = arith.constant dense<0.000000e+00> : vector<4x32xf32>
      %31 = tpu.matmul %30, %21, %cst_27 {dimension_numbers = #tpu.dot_dimension_numbers<[1], [0], [0], [1], [0, 0, 1, 1], [], []>} : vector<4x8xf32>, vector<8x32xf32>, vector<4x32xf32> -> vector<4x32xf32>
      %32 = vector.extract_strided_slice %31 {offsets = [0, 0], sizes = [2, 32], strides = [1, 1]} : vector<4x32xf32> to vector<2x32xf32>
      %33 = vector.extract_strided_slice %31 {offsets = [2, 0], sizes = [2, 32], strides = [1, 1]} : vector<4x32xf32> to vector<2x32xf32>
      %34 = arith.addf %32, %33 : vector<2x32xf32>
      %35 = arith.negf %34 : vector<2x32xf32>
      %36 = math.exp %35 : vector<2x32xf32>
      %cst_28 = arith.constant 1.000000e+00 : f32
      %37 = vector.broadcast %cst_28 : f32 to vector<2x32xf32>
      %38 = arith.addf %37, %36 : vector<2x32xf32>
      %39 = arith.divf %37, %38 : vector<2x32xf32>
      %c0_29 = arith.constant 0 : index
      %c0_30 = arith.constant 0 : index
      %40 = vector.load %arg5[%c0_29, %c0_30] : memref<2x32xf32, #tpu.memory_space<vmem>>, vector<2x32xf32>
      tpu.vector_store %arg5[%c0_29, %c0_30], %39 {strides = array<i32>} : memref<2x32xf32, #tpu.memory_space<vmem>>, vector<2x32xf32>,
    } else {
    }
    return
  }
  func.func @transform_0(%arg0: i32, %arg1: i32) -> (i32, i32, i32) {
    %c0_i32 = arith.constant 0 : i32
    %c0_i32_0 = arith.constant 0 : i32
    return %arg0, %c0_i32, %arg1 : i32, i32, i32
  }
  func.func @transform_1(%arg0: i32, %arg1: i32) -> (i32, i32) {
    %c0_i32 = arith.constant 0 : i32
    %c0_i32_0 = arith.constant 0 : i32
    %c0_i32_1 = arith.constant 0 : i32
    return %c0_i32, %c0_i32_0 : i32, i32
  }
  func.func @transform_2(%arg0: i32, %arg1: i32) -> (i32, i32) {
    %c0_i32 = arith.constant 0 : i32
    %c0_i32_0 = arith.constant 0 : i32
    %c0_i32_1 = arith.constant 0 : i32
    return %c0_i32, %c0_i32_0 : i32, i32
  }
  func.func @transform_3(%arg0: i32, %arg1: i32) -> (i32, i32) {
    %c0_i32 = arith.constant 0 : i32
    %c0_i32_0 = arith.constant 0 : i32
    return %arg0, %c0_i32 : i32, i32
  }
}

</mosaic_0001>

<bundles_post_ra>
// kernel: tpu_custom_call.1
= control target key start
LH: loop header
LB: loop body
LE: loop exit
PB: predicated region body
PF: predicated region fallthrough
CT: control target
= control target key end

     0   :  { %8 = vsyncpa [#allocation5], 0  ;;  %s587_s0 = inlined_call_operand.hbm [shape: f32[2,32,256], index: 0, kind: input, shape index: {}]   ;;  %s588_s1 = inlined_call_operand.vmem [shape: f32[32,8], index: 1, kind: input, shape index: {}]   ;;  %s589_s2 = inlined_call_operand.vmem [shape: f32[8,32], index: 2, kind: input, shape index: {}]   ;;  %s590_s3 = inlined_call_operand.hbm [shape: f32[2,32], index: 3, kind: output, shape index: {}]  }
   0x1   :  { %9 = vsyncpa [#allocation6], 0  ;;  %s501_s12 = smov [#allocation4]   ;;  %s453_s16 = scalar_lea.hbm %s587_s0, 2048 }
   0x2   :  { %s15_s13 = sshll.u32 %s501_s12, 4  ;;  %p454_p0 = scmp.ne.s32.totalorder %s587_s0, %s453_s16  ;;  %s16_s13 = int_to_ptr.vmem [resolvable:$true] %s15_s13 }
   0x3   :  { %p457_p1 = scmp.lt.u32.totalorder %s453_s16, %s587_s0 }
   0x5   :  { %p459_p2 = pnand %p457_p1, %p454_p0 }
   0x7   :  { %462 = shalt.err (!%p459_p2)
}
   0x8   :  { %s463_s21 = scalar_lea.vmem %s16_s13, 2048  ;;  %p468_p4 = scmp.lt.s32.totalorder %s16_s13, %s16_s13 }
   0x9   :  { %p464_p3 = scmp.ne.s32.totalorder %s16_s13, %s463_s21  ;;  %p469_p5 = scmp.lt.s32.totalorder %s463_s21, %s463_s21 }
   0xb   :  { %p470_p6 = por %p469_p5, %p468_p4 }
   0xd   :  { %p471_p7 = pnand %p470_p6, %p464_p3 }
   0xf   :  { %474 = shalt.err (!%p471_p7)
}
  0x10   :  { %s502_s22 = smov 256   ;;  %s503_s23 = smov 16  }
  0x11   :  { %21 = dma.hbm_to_vmem [thread:$0]  %s587_s0, 2048, %s16_s13, [#allocation5], %s502_s22, %s502_s22, %s503_s23  }
  0x12   :  { %497 = dma.done.wait [#allocation5], 2048  }
  0x13   :  { %498 = vsyncadd [#allocation5], 4294965248  ;;  %v44_v0 = vld [vmem:[#allocation4 + $0x40] sm:$0xff]  ;;  %v45_v1 = vld [vmem:[#allocation4 + $0x48] sm:$0xff]  ;;  %vm33_vm0 = vcmask 254976   ;;  %v504_v32 = vmov 0.0   ;;  %v85_v45 = vlaneseq }
  0x14   :  { %v36_v2 = vld [vmem:[#allocation4] sm:$0xff]  ;;  %v65_v3 = vadd.f32 %v45_v1, %v44_v0  ;;  %v37_v4 = vld [vmem:[#allocation4 + $0x8] sm:$0xff]  ;;  %v46_v5 = vld [vmem:[#allocation4 + $0x50] sm:$0xff]  ;;  %v150_v15 = vmax.f32 %v44_v0, %v45_v1  ;;  %34 = vst.msk [vmem:[#allocation2] sm:$0x3] %vm33_vm0, %v504_v32  ;;  %428 = vmatprep.subr.mxu1 %v504_v32  ;;  %v505_v33 = vmov -inf  }
  0x15   :  { %v47_v6 = vld [vmem:[#allocation4 + $0x58] sm:$0xff]  ;;  %v53_v7 = vadd.f32 %v37_v4, %v36_v2  ;;  %v38_v8 = vld [vmem:[#allocation4 + $0x10] sm:$0xff]  ;;  %v138_v13 = vmax.f32 %v36_v2, %v37_v4  ;;  %v48_v16 = vld [vmem:[#allocation4 + $0x60] sm:$0xff]  ;;  %35 = vst.msk [vmem:[#allocation3] sm:$0x3] %vm33_vm0, %v505_v33  ;;  %v506_v37 = vmov 0.0|0.0  }
  0x16   :  { %v39_v9 = vld [vmem:[#allocation4 + $0x18] sm:$0xff]  ;;  %66 = vadd.xlane.f32.xlu1 %v65_v3  ;;  %v68_v10 = vadd.f32 %v47_v6, %v46_v5  ;;  %v153_v14 = vmax.f32 %v46_v5, %v47_v6  ;;  %v49_v17 = vld [vmem:[#allocation4 + $0x68] sm:$0xff]  ;;  %v40_v18 = vld [vmem:[#allocation4 + $0x20] sm:$0xff]  ;;  %433 = vmatprep.subr.bf16.mxu0 %v506_v37  ;;  %vm507_vm1 = vmmov 0   ;;  %v86_v48 = vand.u32 127, %v85_v45 }
  0x17   :  { %54 = vadd.xlane.f32.xlu0 %v53_v7  ;;  %v56_v11 = vadd.f32 %v39_v9, %v38_v8  ;;  %v141_v12 = vmax.f32 %v38_v8, %v39_v9  ;;  %v41_v19 = vld [vmem:[#allocation4 + $0x28] sm:$0xff]  ;;  %v71_v20 = vadd.f32 %v49_v17, %v48_v16  ;;  %v156_v22 = vmax.f32 %v48_v16, %v49_v17  ;;  %v50_v24 = vld [vmem:[#allocation4 + $0x70] sm:$0xff]  ;;  %v51_v25 = vld [vmem:[#allocation4 + $0x78] sm:$0xff] }
  0x18   :  { %v59_v21 = vadd.f32 %v41_v19, %v40_v18  ;;  %v144_v23 = vmax.f32 %v40_v18, %v41_v19  ;;  %v42_v26 = vld [vmem:[#allocation4 + $0x30] sm:$0xff]  ;;  %v43_v27 = vld [vmem:[#allocation4 + $0x38] sm:$0xff]  ;;  %v74_v28 = vadd.f32 %v51_v25, %v50_v24  ;;  %v159_v30 = vmax.f32 %v50_v24, %v51_v25  ;;  %v224_v35 = vld [vmem:[%s588_s1 + $0x8] sm:$0xff]  ;;  %425 = vmatprep.mubr.msk.f32.mxu0 %vm507_vm1, %v504_v32 }
  0x19   :  { %v62_v29 = vadd.f32 %v43_v27, %v42_v26  ;;  %v147_v31 = vmax.f32 %v42_v26, %v43_v27  ;;  %v223_v34 = vld [vmem:[%s588_s1] sm:$0xff]  ;;  %v225_v36 = vld [vmem:[%s588_s1 + $0x10] sm:$0xff]  ;;  %v226_v39 = vld [vmem:[%s588_s1 + $0x18] sm:$0xff]  ;;  %430 = vmatprep.mubr.msk.f32.mxu1 %vm507_vm1, %v504_v32  ;;  %v91_v49 = vadd.s32 4294967288, %v86_v48  ;;  %v88_v52 = vshrl.u32 %v85_v45, 7 }
  0x1a   :  { %69 = vadd.xlane.f32.xlu1 %v68_v10  ;;  %v434_v38 = vpack.c.bf16 %v224_v35, %v223_v34  ;;  %v437_v40 = vpack.c.bf16 %v226_v39, %v225_v36  ;;  %v98_v53 = vadd.s32 4294967280, %v86_v48  ;;  %v105_v57 = vadd.s32 4294967272, %v86_v48 }
  0x1b   :  { %57 = vadd.xlane.f32.xlu0 %v56_v11  ;;  %v94_v54 = vsub.s32 %v91_v49, %v88_v52  ;;  %v89_v58 = vsub.s32 %v86_v48, %v88_v52  ;;  %vm96_vm2 = vcmask 130112   ;;  %vm103_vm3 = vcmask 195712  }
  0x1c   :  { %435 = vmatpush3.bf16.msra.mxu0 %v434_v38  ;;  %v101_v59 = vsub.s32 %v98_v53, %v88_v52  ;;  %v108_v0 = vsub.s32 %v105_v57, %v88_v52  ;;  %vm110_vm4 = vcmask 261312   ;;  %vm131_vm5 = vcmask 1041409   ;;  %v137_v33 = vld [vmem:[#allocation3] sm:$0x3] }
  0x1d   :  { %436 = vmatprep.subr.bf16.mxu0 %v506_v37  ;;  %vm221_vm6 = vcmask 1041408   ;;  %vm228_vm7 = vcmask 261120   ;;  %vm307_vm8 = vcmask 64512  }
  0x1e   :  { %142 = vmax.xlane.f32.xlu1 %v141_v12 }
  0x1f   :  { %139 = vmax.xlane.f32.xlu0 %v138_v13 }
  0x20   :  { %438 = vmatpush3.bf16.msra.mxu0 %v437_v40 }
  0x22   :  { %154 = vmax.xlane.f32.xlu1 %v153_v14 }
  0x23   :  { %151 = vmax.xlane.f32.xlu0 %v150_v15 }
  0x26   :  { %72 = vadd.xlane.f32.xlu1 %v71_v20  ;;  %v52_v20 = vld [vmem:[#allocation2] sm:$0x3] }
  0x27   :  { %60 = vadd.xlane.f32.xlu0 %v59_v21 }
  0x2a   :  { %157 = vmax.xlane.f32.xlu1 %v156_v22 }
  0x2b   :  { %145 = vmax.xlane.f32.xlu0 %v144_v23 }
  0x2e   :  { %75 = vadd.xlane.f32.xlu1 %v74_v28 }
  0x2f   :  { %63 = vadd.xlane.f32.xlu0 %v62_v29 }
  0x32   :  { %160 = vmax.xlane.f32.xlu1 %v159_v30 }
  0x33   :  { %148 = vmax.xlane.f32.xlu0 %v147_v31 }
  0xa3   :  { %v67_v41 = vpop.xlane.xlu1 %66 }
  0xa4   :  { %v55_v42 = vpop.xlane.xlu0 %54  ;;  %v115_v1 = vrot.slane %v67_v41, %v89_v58 }
  0xa5   :  { %v90_v2 = vrot.slane %v55_v42, %v89_v58  ;;  %v227_v42 = vld [vmem:[%s589_s2] sm:$0xff]  ;;  %s508_s2 = smov [#allocation7]  }
  0xa6   :  { %429 = vmatpush3.msra.mxu1 %v227_v42  ;;  %s398_s7 = sshll.u32 %s508_s2, 4  ;;  %s399_s7 = int_to_ptr.vmem [resolvable:$true] %s398_s7 }
  0xa7   :  { %v70_v43 = vpop.xlane.xlu1 %69  ;;  %s475_s8 = scalar_lea.vmem %s399_s7, 32  ;;  %p480_p9 = scmp.lt.s32.totalorder %s399_s7, %s399_s7 }
  0xa8   :  { %v58_v44 = vpop.xlane.xlu0 %57  ;;  %v119_v60 = vrot.slane %v70_v43, %v94_v54  ;;  %p476_p8 = scmp.ne.s32.totalorder %s399_s7, %s475_s8  ;;  %p481_p10 = scmp.lt.s32.totalorder %s475_s8, %s475_s8 }
  0xa9   :  { %v95_v61 = vrot.slane %v58_v44, %v94_v54 }
  0xaa   :  { %v120_v5 = vsel %vm96_vm2, %v119_v60, %v115_v1  ;;  %p482_p11 = por %p481_p10, %p480_p9 }
  0xab   :  { %v143_v46 = vpop.xlane.xlu1 %142  ;;  %v97_v6 = vsel %vm96_vm2, %v95_v61, %v90_v2 }
  0xac   :  { %v140_v47 = vpop.xlane.xlu0 %139  ;;  %v177_v8 = vrot.slane %v143_v46, %v94_v54  ;;  %p483_p12 = pnand %p482_p11, %p476_p8 }
  0xad   :  { %v173_v13 = vrot.slane %v140_v47, %v89_v58 }
  0xaf   :  { %v155_v50 = vpop.xlane.xlu1 %154  ;;  %v178_v27 = vsel %vm96_vm2, %v177_v8, %v173_v13 }
  0xb0   :  { %v152_v51 = vpop.xlane.xlu0 %151  ;;  %v196_v9 = vrot.slane %v155_v50, %v94_v54 }
  0xb1   :  { %v192_v10 = vrot.slane %v152_v51, %v89_v58 }
  0xb3   :  { %v73_v55 = vpop.xlane.xlu1 %72  ;;  %v197_v23 = vsel %vm96_vm2, %v196_v9, %v192_v10 }
  0xb4   :  { %v61_v56 = vpop.xlane.xlu0 %60  ;;  %v124_v3 = vrot.slane %v73_v55, %v101_v59 }
  0xb5   :  { %v102_v4 = vrot.slane %v61_v56, %v101_v59 }
  0xb6   :  { %v125_v14 = vsel %vm103_vm3, %v124_v3, %v120_v5 }
  0xb7   :  { %v158_v62 = vpop.xlane.xlu1 %157  ;;  %v104_v17 = vsel %vm103_vm3, %v102_v4, %v97_v6 }
  0xb8   :  { %v146_v63 = vpop.xlane.xlu0 %145  ;;  %v201_v15 = vrot.slane %v158_v62, %v101_v59 }
  0xb9   :  { %v182_v18 = vrot.slane %v146_v63, %v101_v59 }
  0xba   :  { %v202_v28 = vsel %vm103_vm3, %v201_v15, %v197_v23 }
  0xbb   :  { %v76_v7 = vpop.xlane.xlu1 %75  ;;  %v183_v31 = vsel %vm103_vm3, %v182_v18, %v178_v27 }
  0xbc   :  { %v129_v11 = vrot.slane %v76_v7, %v108_v0  ;;  %v64_v12 = vpop.xlane.xlu0 %63 }
  0xbd   :  { %v109_v16 = vrot.slane %v64_v12, %v108_v0 }
  0xbe   :  { %v130_v19 = vsel %vm110_vm4, %v129_v11, %v125_v14 }
  0xbf   :  { %v111_v21 = vsel %vm110_vm4, %v109_v16, %v104_v17  ;;  %v161_v22 = vpop.xlane.xlu1 %160 }
  0xc0   :  { %v132_v24 = vsel %vm131_vm5, %v130_v19, %v111_v21  ;;  %v206_v25 = vrot.slane %v161_v22, %v108_v0  ;;  %v149_v26 = vpop.xlane.xlu0 %148 }
  0xc1   :  { %v187_v29 = vrot.slane %v149_v26, %v108_v0  ;;  %v134_v30 = vadd.f32 %v132_v24, %v52_v20 }
  0xc2   :  { %v207_v32 = vsel %vm110_vm4, %v206_v25, %v202_v28 }
  0xc3   :  { %v188_v34 = vsel %vm110_vm4, %v187_v29, %v183_v31  ;;  %136 = vst.msk [vmem:[#allocation2] sm:$0x3] %vm33_vm0, %v134_v30 }
  0xc4   :  { %v208_v35 = vsel %vm131_vm5, %v207_v32, %v188_v34 }
  0xc5   :  { %v210_v36 = vmax.f32 %v137_v33, %v208_v35 }
  0xc7   :  { %211 = vst.msk [vmem:[#allocation3] sm:$0x3] %vm33_vm0, %v210_v36 }
  0xca   :  { %v215_v37 = vld [vmem:[#allocation2] sm:$0x3] }
  0xcb   :  { %v216_v39 = vmul.f32 0.00390625, %v215_v37 }
  0xce   :  { %v217_v38 = vld [vmem:[#allocation3] sm:$0x3] }
  0xcf   :  { %v219_v40 = vrot.slane %v217_v38, 6 }
  0xd1   :  { %v222_v41 = vsel %vm221_vm6, %v216_v39, %v219_v40 }
  0xd2   :  { %426 = vmatmul.mubr.msk.f32.vlgmr.msra.gmra.mrb[0].mxu0 %vm228_vm7, %v222_v41 }
 0x1a5   :  { %v298_v43 = vpop.f32.mrb[0].mxu0 }
 0x1a6   :  { %v303_v44 = vmul.f32 0.70710677, %v298_v43  ;;  %v427_v45 = vpop.f32.mrb[1].mxu0  ;;  %v302_v47 = vmul.f32 0.5, %v298_v43 }
 0x1a8   :  { %447 = verf.f32 %v303_v44 }
 0x1b2   :  { %v448_v46 = vpop.eup %447 }
 0x1b3   :  { %v305_v48 = vadd.f32 1.0, %v448_v46 }
 0x1b5   :  { %v306_v49 = vmul.f32 %v305_v48, %v302_v47 }
 0x1b7   :  { %431 = vmatmul.mubr.msk.f32.vlgmr.msra.gmra.mrb[0].mxu1 %vm307_vm8, %v306_v49 }
 0x28a   :  { %v377_v50 = vpop.f32.mrb[0].mxu1 }
 0x28b   :  { %v382_v51 = vrot.slane %v377_v50, 2  ;;  %v432_v52 = vpop.f32.mrb[1].mxu1 }
 0x28d   :  { %v384_v53 = vadd.f32 %v382_v51, %v377_v50 }
 0x28f   :  { %v409_v54 = vmul.f32 -1.442695, %v384_v53 }
 0x291   :  { %449 = vpow2.f32 %v409_v54 }
 0x29b   :  { %v450_v55 = vpop.eup %449 }
 0x29c   :  { %v388_v56 = vadd.f32 1.0, %v450_v55 }
 0x29e   :  { %451 = vrcp.f32 %v388_v56 }
 0x2a8   :  { %v452_v57 = vpop.eup %451 }
 0x2a9   :  { %391 = vst.msk [vmem:[#allocation7] sm:$0x3] %vm33_vm0, %v452_v57 }
 0x2aa   :  { %486 = shalt.err (!%p483_p12)
}
 0x2ab   :  { %s487_s11 = scalar_lea.hbm %s590_s3, 32 }
 0x2ac   :  { %p488_p13 = scmp.ne.s32.totalorder %s590_s3, %s487_s11  ;;  %p491_p0 = scmp.lt.u32.totalorder %s487_s11, %s590_s3 }
 0x2ae   :  { %p493_p1 = pnand %p491_p0, %p488_p13 }
 0x2b0   :  { %496 = shalt.err (!%p493_p1)
}
 0x2b1   :  { %401 = dma.vmem_to_hbm [thread:$0]  %s399_s7, 32, %s590_s3, [#allocation6]  }
 0x2b2   :  { %499 = dma.done.wait [#allocation6], 32  }
 0x2b3   :  { %500 = vsyncadd [#allocation6], 4294967264 }
 0x2b4   :  { %405 = vsyncpa [#allocation5], 1 }
 0x2b5   :  { %406 = vsyncpa [#allocation6], 1 }

</bundles_post_ra>
